<compile_context>
chip_gen: v7x
topology: tpu7x:2x2x1
jax: 0.10.0
libtpu: 0.0.40
codegen_flags: <defaults>
</compile_context>

<pallas_src>
import jax
import jax.numpy as jnp
from jax.experimental import pallas as pl
from jax.experimental.pallas import tpu as pltpu

_VERY_SMALL = 1e-8
_LANES = 128


def _round_up(x: int, m: int) -> int:
    return ((x + m - 1) // m) * m


# --------------------------------------------------------------------------
# Kernel: pure lane-dense elementwise op on stacked [alpha, beta, gamma] rows.
# --------------------------------------------------------------------------
def _transition_loss_not_kernel(x_ref, out_ref):
    # x_ref block: (3, bt, 128) f32 -> rows of alpha / beta / gamma columns.
    a = x_ref[0]                                         # (bt, 128)
    b = x_ref[1]                                         # (bt, 128)
    g = x_ref[2]                                         # (bt, 128)
    # log(clamp(1 - exp(log_y_gamma), 1e-8)) -- single exp + single log.
    log_not_g = jnp.log(jnp.maximum(1.0 - jnp.exp(g), _VERY_SMALL))
    # relu(log_alpha + log_beta - log_not_gamma), lane-dense store.
    out_ref[...] = jnp.maximum(0.0, a + b - log_not_g)


def _pick_tile(rows_needed: int, block_rows: int) -> int:
    # Clamp requested tile to 8..2048 rows (1 MiB f32 per buffer at 2048).
    block_rows = min(max(int(block_rows), 8), 2048)
    bt = max(8, min(_round_up(block_rows, 8), _round_up(rows_needed, 8)))
    # v7x has 2 TensorCores: make sure the "parallel" grid has >= 2 steps
    # whenever there is enough work to split.
    if rows_needed >= 16:
        bt = min(bt, max(8, _round_up(pl.cdiv(rows_needed, 2), 8)))
    return bt


def _launch(stacked, bt):
    """stacked: (3, R, 128) f32 with R % bt == 0 -> (R, 128) f32 losses."""
    _, R, _ = stacked.shape
    grid = (R // bt,)
    # Real (lane-padded) double-buffered footprint: (3 in + 1 out) x 2 bufs.
    vmem_bytes = 2 * (3 + 1) * bt * _LANES * 4
    cost = pl.CostEstimate(
        flops=5 * R * _LANES,
        transcendentals=2 * R * _LANES,
        bytes_accessed=4 * R * _LANES * 4,
    )
    return pl.pallas_call(
        _transition_loss_not_kernel,
        out_shape=jax.ShapeDtypeStruct((R, _LANES), jnp.float32),
        grid=grid,
        in_specs=[pl.BlockSpec((3, bt, _LANES), lambda i: (0, i, 0))],
        out_specs=pl.BlockSpec((bt, _LANES), lambda i: (i, 0)),
        compiler_params=pltpu.CompilerParams(
            dimension_semantics=("parallel",),
            vmem_limit_bytes=max(4 * vmem_bytes, 4 << 20),
        ),
        cost_estimate=cost,
    )(stacked)


# --------------------------------------------------------------------------
# Single-term wrapper: exact equivalent of transition_loss_not_.forward.
# --------------------------------------------------------------------------
def transition_loss_not(log_y_alpha, log_y_beta, log_y_gamma,
                        alpha_index, beta_index, gamma_index, *,
                        block_rows: int = 1024):
    """Returns max(0, la[:,ai] + lb[:,bi] - log(clamp(1-exp(lg[:,gi]),1e-8)))."""
    B, C = log_y_alpha.shape
    assert log_y_beta.shape == (B, C) and log_y_gamma.shape == (B, C)
    # TODO(synk): indices are compile-time ints (true at every call site in
    # all_loss_aug.py); traced/dynamic indices would need scalar prefetch.
    ai, bi, gi = int(alpha_index), int(beta_index), int(gamma_index)
    assert 0 <= ai < C and 0 <= bi < C and 0 <= gi < C

    # Static column gather + upcast in the wrapper (free; XLA fuses it with
    # the pad/reshape).  Only 3*B f32 of useful data ever reaches the kernel.
    cols = jnp.stack(
        [log_y_alpha[:, ai], log_y_beta[:, bi], log_y_gamma[:, gi]],
        axis=0).astype(jnp.float32)                       # (3, B)

    rows_needed = int(pl.cdiv(B, _LANES))
    bt = _pick_tile(rows_needed, block_rows)
    rows_pad = _round_up(rows_needed, bt)
    B_pad = rows_pad * _LANES
    if B_pad != B:
        cols = jnp.pad(cols, ((0, 0), (0, B_pad - B)))
    stacked = cols.reshape(3, rows_pad, _LANES)

    out = _launch(stacked, bt)                            # (rows_pad, 128)
    return out.reshape(-1)[:B]


# --------------------------------------------------------------------------
# Multi-term wrapper: evaluate many (ai, bi, gi) triples in ONE pallas_call.
# --------------------------------------------------------------------------
def transition_loss_not_multi(log_y_alpha, log_y_beta, log_y_gamma,
                              index_triples, *, block_rows: int = 1024):
    """Batched version: returns (n_terms, B) float32, one row per triple."""
    B, C = log_y_alpha.shape
    T = len(index_triples)
    assert T >= 1
    a_cols = jnp.stack([log_y_alpha[:, int(a)] for a, _, _ in index_triples], 0)
    b_cols = jnp.stack([log_y_beta[:, int(b)] for _, b, _ in index_triples], 0)
    g_cols = jnp.stack([log_y_gamma[:, int(g)] for _, _, g in index_triples], 0)
    cols = jnp.stack([a_cols, b_cols, g_cols], 0).astype(jnp.float32)  # (3,T,B)

    rows_per_term = int(pl.cdiv(B, _LANES))
    B_lane = rows_per_term * _LANES
    if B_lane != B:
        cols = jnp.pad(cols, ((0, 0), (0, 0), (0, B_lane - B)))
    rows_total = T * rows_per_term
    stacked = cols.reshape(3, rows_total, _LANES)

    bt = _pick_tile(rows_total, block_rows)
    rows_pad = _round_up(rows_total, bt)
    if rows_pad != rows_total:
        stacked = jnp.pad(stacked, ((0, 0), (0, rows_pad - rows_total), (0, 0)))

    out = _launch(stacked, bt)                            # (rows_pad, 128)
    out = out[:rows_total].reshape(T, rows_per_term * _LANES)[:, :B]
    return out


# --------------------------------------------------------------------------
# Pure-JAX reference (mirror of the PyTorch forward).
# --------------------------------------------------------------------------
def _reference(la, lb, lg, ai, bi, gi):
    la = la.astype(jnp.float32)
    lb = lb.astype(jnp.float32)
    lg = lg.astype(jnp.float32)
    log_not_g = jnp.log(jnp.maximum(1.0 - jnp.exp(lg), _VERY_SMALL))
    return jnp.maximum(0.0, la[:, ai] + lb[:, bi] - log_not_g[:, gi])


if __name__ == "__main__":
    key = jax.random.PRNGKey(0)
    k1, k2, k3, k4, k5, k6, k7, k8, k9 = jax.random.split(key, 9)

    # Small demo shapes consistent with the module: (batch, num_classes) with
    # class indices up to 7 referenced in all_loss_aug.py -> C = 8.
    B, C = 16, 8
    ai, bi, gi = 0, 4, 1  # one of the actual call sites (alpha, beta, not-gamma)

    la = jax.nn.log_softmax(jax.random.normal(k1, (B, C), jnp.float32), axis=1)
    lb = jax.nn.log_softmax(jax.random.normal(k2, (B, C), jnp.float32), axis=1)
    lg = jax.nn.log_softmax(jax.random.normal(k3, (B, C), jnp.float32), axis=1)

    out = transition_loss_not(la, lb, lg, ai, bi, gi)
    jax.block_until_ready(out)
    ref = _reference(la, lb, lg, ai, bi, gi)
    assert out.shape == (B,)
    assert jnp.allclose(out, ref, atol=1e-5, rtol=1e-5), (out, ref)

    # Check 2: larger, non-aligned batch -> exercises grid >= 2 (v7x split),
    # lane padding and the padded-row slice-off.
    B2 = 2100
    la2 = jax.nn.log_softmax(jax.random.normal(k4, (B2, C), jnp.float32), axis=1)
    lb2 = jax.nn.log_softmax(jax.random.normal(k5, (B2, C), jnp.float32), axis=1)
    lg2 = jax.nn.log_softmax(jax.random.normal(k6, (B2, C), jnp.float32), axis=1)
    out2 = transition_loss_not(la2, lb2, lg2, 5, 2, 0)
    jax.block_until_ready(out2)
    ref2 = _reference(la2, lb2, lg2, 5, 2, 0)
    assert out2.shape == (B2,)
    assert jnp.allclose(out2, ref2, atol=1e-5, rtol=1e-5)

    # Check 3: several loss terms fused into a single pallas_call.
    B3 = 300
    la3 = jax.nn.log_softmax(jax.random.normal(k7, (B3, C), jnp.float32), axis=1)
    lb3 = jax.nn.log_softmax(jax.random.normal(k8, (B3, C), jnp.float32), axis=1)
    lg3 = jax.nn.log_softmax(jax.random.normal(k9, (B3, C), jnp.float32), axis=1)
    triples = [(0, 4, 1), (5, 2, 0), (3, 3, 7)]
    out3 = transition_loss_not_multi(la3, lb3, lg3, triples)
    jax.block_until_ready(out3)
    assert out3.shape == (len(triples), B3)
    for t, (a, b, g) in enumerate(triples):
        r = _reference(la3, lb3, lg3, a, b, g)
        assert jnp.allclose(out3[t], r, atol=1e-5, rtol=1e-5)

    print("KERNEL_OK")
</pallas_src>

<mosaic_0001>
module attributes {stable_mosaic.version = 11 : i64} {
  func.func @_transition_loss_not_kernel(%arg0: i32, %arg1: memref<3x8x128xf32, #tpu.memory_space<vmem>>, %arg2: memref<8x128xf32, #tpu.memory_space<vmem>>) attributes {dimension_semantics = [#tpu.dimension_semantics<parallel>], iteration_bounds = array<i64: 1>, scalar_prefetch = 0 : i64, scratch_operands = 0 : i64, tpu.core_type = #tpu.core_type<tc>, window_params = [{transform_indices = @transform_0, window_bounds = array<i64: 3, 8, 128>}, {transform_indices = @transform_1, window_bounds = array<i64: 8, 128>}]} {
    %c0 = arith.constant 0 : index
    %c0_0 = arith.constant 0 : index
    %c0_1 = arith.constant 0 : index
    %0 = vector.load %arg1[%c0, %c0_0, %c0_1] : memref<3x8x128xf32, #tpu.memory_space<vmem>>, vector<1x8x128xf32>
    %1 = vector.shape_cast %0 : vector<1x8x128xf32> to vector<8x128xf32>
    %c1 = arith.constant 1 : index
    %c0_2 = arith.constant 0 : index
    %c0_3 = arith.constant 0 : index
    %2 = vector.load %arg1[%c1, %c0_2, %c0_3] : memref<3x8x128xf32, #tpu.memory_space<vmem>>, vector<1x8x128xf32>
    %3 = vector.shape_cast %2 : vector<1x8x128xf32> to vector<8x128xf32>
    %c2 = arith.constant 2 : index
    %c0_4 = arith.constant 0 : index
    %c0_5 = arith.constant 0 : index
    %4 = vector.load %arg1[%c2, %c0_4, %c0_5] : memref<3x8x128xf32, #tpu.memory_space<vmem>>, vector<1x8x128xf32>
    %5 = vector.shape_cast %4 : vector<1x8x128xf32> to vector<8x128xf32>
    %6 = math.exp %5 : vector<8x128xf32>
    %cst = arith.constant 1.000000e+00 : f32
    %7 = vector.broadcast %cst : f32 to vector<8x128xf32>
    %8 = arith.subf %7, %6 : vector<8x128xf32>
    %cst_6 = arith.constant 9.99999993E-9 : f32
    %9 = vector.broadcast %cst_6 : f32 to vector<8x128xf32>
    %10 = arith.maximumf %8, %9 : vector<8x128xf32>
    %11 = math.log %10 : vector<8x128xf32>
    %12 = arith.addf %1, %3 : vector<8x128xf32>
    %13 = arith.subf %12, %11 : vector<8x128xf32>
    %cst_7 = arith.constant 0.000000e+00 : f32
    %14 = vector.broadcast %cst_7 : f32 to vector<8x128xf32>
    %15 = arith.maximumf %14, %13 : vector<8x128xf32>
    %c0_8 = arith.constant 0 : index
    %c0_9 = arith.constant 0 : index
    %16 = vector.load %arg2[%c0_8, %c0_9] : memref<8x128xf32, #tpu.memory_space<vmem>>, vector<8x128xf32>
    tpu.vector_store %arg2[%c0_8, %c0_9], %15 {strides = array<i32>} : memref<8x128xf32, #tpu.memory_space<vmem>>, vector<8x128xf32>,
    return
  }
  func.func @transform_0(%arg0: i32) -> (i32, i32, i32) {
    %c0_i32 = arith.constant 0 : i32
    %c0_i32_0 = arith.constant 0 : i32
    %c0_i32_1 = arith.constant 0 : i32
    return %c0_i32, %arg0, %c0_i32_0 : i32, i32, i32
  }
  func.func @transform_1(%arg0: i32) -> (i32, i32) {
    %c0_i32 = arith.constant 0 : i32
    %c0_i32_0 = arith.constant 0 : i32
    return %arg0, %c0_i32 : i32, i32
  }
}

</mosaic_0001>

<bundles_post_ra>
// kernel: tpu_custom_call.1
= control target key start
LH: loop header
LB: loop body
LE: loop exit
PB: predicated region body
PF: predicated region fallthrough
CT: control target
= control target key end

     0   :  { %6 = vsyncpa [#allocation3], 0  ;;  %s147_s0 = inlined_call_operand.hbm [shape: f32[3,8,128], index: 0, kind: input, shape index: {}]   ;;  %s148_s1 = inlined_call_operand.hbm [shape: f32[8,128], index: 1, kind: output, shape index: {}]  }
   0x1   :  { %7 = vsyncpa [#allocation4], 0  ;;  %s109_s6 = smov [#allocation2]   ;;  %s61_s10 = scalar_lea.hbm %s147_s0, 384 }
   0x2   :  { %s13_s7 = sshll.u32 %s109_s6, 4  ;;  %p62_p0 = scmp.ne.s32.totalorder %s147_s0, %s61_s10  ;;  %s14_s7 = int_to_ptr.vmem [resolvable:$true] %s13_s7 }
   0x3   :  { %p65_p1 = scmp.lt.u32.totalorder %s61_s10, %s147_s0 }
   0x5   :  { %p67_p2 = pnand %p65_p1, %p62_p0 }
   0x7   :  { %70 = shalt.err (!%p67_p2)
}
   0x8   :  { %s71_s15 = scalar_lea.vmem %s14_s7, 384  ;;  %p76_p4 = scmp.lt.s32.totalorder %s14_s7, %s14_s7 }
   0x9   :  { %p72_p3 = scmp.ne.s32.totalorder %s14_s7, %s71_s15  ;;  %p77_p5 = scmp.lt.s32.totalorder %s71_s15, %s71_s15 }
   0xb   :  { %p78_p6 = por %p77_p5, %p76_p4 }
   0xd   :  { %p79_p7 = pnand %p78_p6, %p72_p3 }
   0xf   :  { %82 = shalt.err (!%p79_p7)
}
  0x10   :  { %s110_s16 = smov 128   ;;  %s111_s17 = smov 8  }
  0x11   :  { %19 = dma.hbm_to_vmem [thread:$0]  %s147_s0, 384, %s14_s7, [#allocation3], %s110_s16, %s110_s16, %s111_s17  }
  0x12   :  { %105 = dma.done.wait [#allocation3], 384  }
  0x13   :  { %106 = vsyncadd [#allocation3], 4294966912  ;;  %v27_v0 = vld [vmem:[#allocation2 + $0x10] sm:$0xff]  ;;  %v23_v5 = vld [vmem:[#allocation2] sm:$0xff]  ;;  %s112_s20 = smov [#allocation5]  }
  0x14   :  { %v28_v1 = vmul.f32 1.442695, %v27_v0  ;;  %v25_v6 = vld [vmem:[#allocation2 + $0x8] sm:$0xff]  ;;  %s44_s21 = sshll.u32 %s112_s20, 4  ;;  %s45_s21 = int_to_ptr.vmem [resolvable:$true] %s44_s21 }
  0x15   :  { %v34_v7 = vadd.f32 %v25_v6, %v23_v5  ;;  %s83_s0 = scalar_lea.vmem %s45_s21, 128  ;;  %p88_p9 = scmp.lt.s32.totalorder %s45_s21, %s45_s21 }
  0x16   :  { %57 = vpow2.f32 %v28_v1  ;;  %p84_p8 = scmp.ne.s32.totalorder %s45_s21, %s83_s0  ;;  %p89_p10 = scmp.lt.s32.totalorder %s83_s0, %s83_s0 }
  0x18   :  { %p90_p11 = por %p89_p10, %p88_p9 }
  0x1a   :  { %p91_p12 = pnand %p90_p11, %p84_p8 }
  0x20   :  { %v58_v2 = vpop.eup %57 }
  0x21   :  { %v30_v3 = vsub.f32 1.0, %v58_v2 }
  0x23   :  { %v31_v4 = vmax.f32 %v30_v3, 1e-08 }
  0x25   :  { %59 = vlog2.f32 %v31_v4 }
  0x2f   :  { %v60_v8 = vpop.eup %59 }
  0x30   :  { %v33_v9 = vmul.f32 0.6931472, %v60_v8 }
  0x32   :  { %v35_v10 = vsub.f32 %v34_v7, %v33_v9 }
  0x34   :  { %v36_v11 = vmax.f32 %v35_v10, 0.0 }
  0x36   :  { %37 = vst [vmem:[#allocation5] sm:$0xff] %v36_v11 }
  0x37   :  { %94 = shalt.err (!%p91_p12)
}
  0x38   :  { %s95_s24 = scalar_lea.hbm %s148_s1, 128 }
  0x39   :  { %p96_p13 = scmp.ne.s32.totalorder %s148_s1, %s95_s24  ;;  %p99_p0 = scmp.lt.u32.totalorder %s95_s24, %s148_s1 }
  0x3b   :  { %p101_p1 = pnand %p99_p0, %p96_p13 }
  0x3d   :  { %104 = shalt.err (!%p101_p1)
}
  0x3e   :  { %47 = dma.vmem_to_hbm [thread:$0]  %s45_s21, 128, %s148_s1, [#allocation4]  }
  0x3f   :  { %107 = dma.done.wait [#allocation4], 128  }
  0x40   :  { %108 = vsyncadd [#allocation4], 4294967168 }
  0x41   :  { %51 = vsyncpa [#allocation3], 1 }
  0x42   :  { %52 = vsyncpa [#allocation4], 1 }

</bundles_post_ra>
